<compile_context>
chip_gen: v7x
topology: tpu7x:2x2x1
jax: 0.10.0
libtpu: 0.0.40
codegen_flags: <defaults>
</compile_context>

<pallas_src>
import jax
import jax.numpy as jnp
from jax.experimental import pallas as pl
from jax.experimental.pallas import tpu as pltpu


def cnn_stem_kernel(p_ref, w_ref, shift_ref, o_ref):
    """One M-tile of the im2col'd conv stem.

    p_ref:     (TM, 9*Cin)  im2col patch rows (rows beyond N*H*W are zero pad)
    w_ref:     (9*Cin, Cp)  conv weights with BN scale folded in, Cout padded to Cp
    shift_ref: (1, Cp)      folded BN shift = beta - mean * scale (zero in pad lanes)
    o_ref:     (TM, Cp)     ReLU(conv + BN) output tile
    """
    acc = jnp.dot(p_ref[...], w_ref[...], preferred_element_type=jnp.float32)
    y = jnp.maximum(acc + shift_ref[...], 0.0)   # fused BN shift + ReLU epilogue
    o_ref[...] = y.astype(o_ref.dtype)


def _choose_tile_m(m_total):
    """Tile size for the flattened M = N*H*W dim.

    Large enough to amortize per-grid-step overhead (target up to 512 rows), but
    always leaving >= 2 grid steps so v7x can shard the parallel axis across its
    two TensorCores.
    """
    tm = min(512, pl.cdiv(m_total, 2))
    tm = max(8, ((tm + 7) // 8) * 8)
    return tm


def cnn_stem(x_nchw, conv_w, bn_gamma, bn_beta, bn_mean, bn_var, *, eps=1e-5):
    """CNNStem forward (CIFAR 'default' mode): conv3x3(s1, p1, no bias) -> BN -> ReLU.

    x_nchw: (N, Cin, H, W); conv_w: (Cout, Cin, 3, 3); BN params: (Cout,).
    Returns (N, Cout, H, W), matching the PyTorch module layout.
    """
    N, Cin, H, W = x_nchw.shape
    Cout = conv_w.shape[0]
    Cp = ((Cout + 127) // 128) * 128          # lane-dense output channel count
    K = 9 * Cin                               # im2col contraction dim

    in_dtype = x_nchw.dtype
    # TODO(synk): for large Cin/Cout on v6e/v7x, cast patches/weights to bf16
    #             (keeping f32 accumulation) for MXU throughput + 2x bandwidth.

    # ---- Layout plumbing in plain JAX -------------------------------------
    # NHWC + zero spatial padding for the 3x3/s1/p1 conv.
    x = jnp.transpose(x_nchw, (0, 2, 3, 1))
    x = jnp.pad(x, ((0, 0), (1, 1), (1, 1), (0, 0)))

    # im2col: (N, H, W, 9*Cin) with tap order (ky, kx, cin), flattened to
    # (N*H*W, 9*Cin) so the whole conv is one MXU matmul.
    taps = [x[:, ky:ky + H, kx:kx + W, :] for ky in range(3) for kx in range(3)]
    patches = jnp.concatenate(taps, axis=-1).reshape(N * H * W, K).astype(in_dtype)

    # Fold BatchNorm (inference) scale into the conv weights; keep only shift.
    scale = (bn_gamma / jnp.sqrt(bn_var + eps)).astype(jnp.float32)
    shift = (bn_beta - bn_mean * scale).astype(jnp.float32)

    # (Cout, Cin, 3, 3) -> (3, 3, Cin, Cout) * scale -> pad Cout -> (9*Cin, Cp).
    w = jnp.transpose(conv_w, (2, 3, 1, 0)).astype(jnp.float32) * scale[None, None, None, :]
    w = jnp.pad(w, ((0, 0), (0, 0), (0, 0), (0, Cp - Cout)))
    w = w.reshape(K, Cp).astype(in_dtype)

    shift = jnp.pad(shift, (0, Cp - Cout)).reshape(1, Cp)

    # ---- Grid / tiling ------------------------------------------------------
    M = N * H * W
    TM = _choose_tile_m(M)
    Mp = pl.cdiv(M, TM) * TM
    if Mp != M:
        patches = jnp.pad(patches, ((0, Mp - M), (0, 0)))   # pad rows -> ReLU(shift), sliced off
    n_tiles = Mp // TM

    out = pl.pallas_call(
        cnn_stem_kernel,
        out_shape=jax.ShapeDtypeStruct((Mp, Cp), in_dtype),
        grid=(n_tiles,),
        in_specs=[
            pl.BlockSpec((TM, K), lambda m: (m, 0)),
            pl.BlockSpec((K, Cp), lambda m: (0, 0)),
            pl.BlockSpec((1, Cp), lambda m: (0, 0)),
        ],
        out_specs=pl.BlockSpec((TM, Cp), lambda m: (m, 0)),
        compiler_params=pltpu.CompilerParams(
            dimension_semantics=("parallel",),
        ),
    )(patches, w, shift)

    # Drop row/channel padding, restore NCHW to match the PyTorch module.
    out = out[:M, :Cout].reshape(N, H, W, Cout)
    return jnp.transpose(out, (0, 3, 1, 2))


if __name__ == "__main__":
    # Small shapes consistent with the module: batch=2, dim_in=4, spatial=16, dim_out=32.
    N, Cin, H, W = 2, 4, 16, 16
    Cout = 32
    eps = 1e-5

    key = jax.random.PRNGKey(0)
    kx, kw, kg, kb, km, kv = jax.random.split(key, 6)
    x = jax.random.normal(kx, (N, Cin, H, W), dtype=jnp.float32)
    conv_w = jax.random.normal(kw, (Cout, Cin, 3, 3), dtype=jnp.float32) * 0.1
    bn_gamma = 1.0 + 0.1 * jax.random.normal(kg, (Cout,), dtype=jnp.float32)
    bn_beta = 0.1 * jax.random.normal(kb, (Cout,), dtype=jnp.float32)
    bn_mean = 0.1 * jax.random.normal(km, (Cout,), dtype=jnp.float32)
    bn_var = jax.random.uniform(kv, (Cout,), dtype=jnp.float32, minval=0.5, maxval=1.5)

    out = cnn_stem(x, conv_w, bn_gamma, bn_beta, bn_mean, bn_var, eps=eps)
    out = jax.block_until_ready(out)

    # Pure-JAX reference: conv3x3(s1, p1) -> inference BN -> ReLU.
    ref = jax.lax.conv_general_dilated(
        x, conv_w, window_strides=(1, 1), padding=((1, 1), (1, 1)),
        dimension_numbers=("NCHW", "OIHW", "NCHW"))
    ref = (ref - bn_mean[None, :, None, None]) * (
        bn_gamma[None, :, None, None] / jnp.sqrt(bn_var[None, :, None, None] + eps)
    ) + bn_beta[None, :, None, None]
    ref = jnp.maximum(ref, 0.0)

    assert out.shape == (N, Cout, H, W)
    assert jnp.allclose(out, ref, atol=1e-3, rtol=1e-3), "mismatch vs reference"

    print("KERNEL_OK")
</pallas_src>

<mosaic_0001>
module attributes {stable_mosaic.version = 11 : i64} {
  func.func @cnn_stem_kernel(%arg0: i32, %arg1: memref<256x36xf32, #tpu.memory_space<vmem>>, %arg2: memref<36x128xf32, #tpu.memory_space<vmem>>, %arg3: memref<1x128xf32, #tpu.memory_space<vmem>>, %arg4: memref<256x128xf32, #tpu.memory_space<vmem>>) attributes {dimension_semantics = [#tpu.dimension_semantics<parallel>], iteration_bounds = array<i64: 2>, scalar_prefetch = 0 : i64, scratch_operands = 0 : i64, tpu.core_type = #tpu.core_type<tc>, window_params = [{transform_indices = @transform_0, window_bounds = array<i64: 256, 36>}, {pipeline_mode = #tpu.pipeline_mode<synchronous>, transform_indices = @transform_1, window_bounds = array<i64: 36, 128>}, {pipeline_mode = #tpu.pipeline_mode<synchronous>, transform_indices = @transform_2, window_bounds = array<i64: 1, 128>}, {transform_indices = @transform_3, window_bounds = array<i64: 256, 128>}]} {
    %c0 = arith.constant 0 : index
    %c0_0 = arith.constant 0 : index
    %0 = vector.load %arg1[%c0, %c0_0] : memref<256x36xf32, #tpu.memory_space<vmem>>, vector<256x36xf32>
    %c0_1 = arith.constant 0 : index
    %c0_2 = arith.constant 0 : index
    %1 = vector.load %arg2[%c0_1, %c0_2] : memref<36x128xf32, #tpu.memory_space<vmem>>, vector<36x128xf32>
    %cst = arith.constant dense<0.000000e+00> : vector<256x128xf32>
    %2 = tpu.matmul %0, %1, %cst {dimension_numbers = #tpu.dot_dimension_numbers<[1], [0], [0], [1], [0, 0, 1, 1], [], []>} : vector<256x36xf32>, vector<36x128xf32>, vector<256x128xf32> -> vector<256x128xf32>
    %c0_3 = arith.constant 0 : index
    %c0_4 = arith.constant 0 : index
    %3 = vector.load %arg3[%c0_3, %c0_4] : memref<1x128xf32, #tpu.memory_space<vmem>>, vector<1x128xf32>
    %4 = vector.broadcast %3 : vector<1x128xf32> to vector<256x128xf32>
    %5 = arith.addf %2, %4 : vector<256x128xf32>
    %cst_5 = arith.constant 0.000000e+00 : f32
    %6 = vector.broadcast %cst_5 : f32 to vector<256x128xf32>
    %7 = arith.maximumf %5, %6 : vector<256x128xf32>
    %c0_6 = arith.constant 0 : index
    %c0_7 = arith.constant 0 : index
    %8 = vector.load %arg4[%c0_6, %c0_7] : memref<256x128xf32, #tpu.memory_space<vmem>>, vector<256x128xf32>
    tpu.vector_store %arg4[%c0_6, %c0_7], %7 {strides = array<i32>} : memref<256x128xf32, #tpu.memory_space<vmem>>, vector<256x128xf32>,
    return
  }
  func.func @transform_0(%arg0: i32) -> (i32, i32) {
    %c0_i32 = arith.constant 0 : i32
    %c0_i32_0 = arith.constant 0 : i32
    return %arg0, %c0_i32 : i32, i32
  }
  func.func @transform_1(%arg0: i32) -> (i32, i32) {
    %c0_i32 = arith.constant 0 : i32
    %c0_i32_0 = arith.constant 0 : i32
    %c0_i32_1 = arith.constant 0 : i32
    return %c0_i32, %c0_i32_0 : i32, i32
  }
  func.func @transform_2(%arg0: i32) -> (i32, i32) {
    %c0_i32 = arith.constant 0 : i32
    %c0_i32_0 = arith.constant 0 : i32
    %c0_i32_1 = arith.constant 0 : i32
    return %c0_i32, %c0_i32_0 : i32, i32
  }
  func.func @transform_3(%arg0: i32) -> (i32, i32) {
    %c0_i32 = arith.constant 0 : i32
    %c0_i32_0 = arith.constant 0 : i32
    return %arg0, %c0_i32 : i32, i32
  }
}

</mosaic_0001>

<bundles_post_ra>
// kernel: tpu_custom_call.1
= control target key start
LH: loop header
LB: loop body
LE: loop exit
PB: predicated region body
PF: predicated region fallthrough
CT: control target
= control target key end

     0   :  { %8 = vsyncpa [#allocation3], 0  ;;  %s1229_s0 = inlined_call_operand.vmem [shape: f32[512,36], index: 0, kind: input, shape index: {}]   ;;  %s1230_s1 = inlined_call_operand.vmem [shape: f32[36,128], index: 1, kind: input, shape index: {}]   ;;  %s1231_s2 = inlined_call_operand.vmem [shape: f32[1,128], index: 2, kind: input, shape index: {}]   ;;  %s1232_s3 = inlined_call_operand.hbm [shape: f32[512,128], index: 3, kind: output, shape index: {}]  }
   0x1   :  { %10 = vsyncpa [#allocation3 + $0x1], 0  ;;  %s966_s12 = smov 0   ;;  %s968_s13 = smov 0  }
   0x2   :  { %s970_s14 = smov 0   ;;  %s972_s15 = smov 0  }
   0x3 LB: > { %s987_s16 = sadd.s32 4294967295, %s941_s15   ;;  %s682_s17 = sadd.s32 4294967294, %s941_s15   ;;  %s941_s15 = sphi %s972_s15, %s1238_s15   ;;  %s937_s14 = sphi %s970_s14, %s1237_s14   ;;  %s933_s13 = sphi %s968_s13, %s1236_s13   ;;  %s929_s12 = sphi %s966_s12, %s1235_s12  }
   0x4   : > { %s991_s18 = sadd.s32 1, %s941_s15   ;;  %s91_s19 = sadd.s32 1, %s937_s14 }
   0x5   : > { %s88_s20 = ssub.s32 %s941_s15, %s991_s18  ;;  %p101_p0 = scmp.ne.s32.totalorder %s937_s14, %s933_s13 }
   0x6   : > { %p89_p1 = scmp.eq.s32.totalorder %s88_s20, 0  ;;  %p102_p2 = scmp.eq.s32.totalorder %s987_s16, 1 }
   0x7   : > { %p107_p3 = scmp.ne.s32.totalorder %s933_s13, %s929_s12  ;;  %p108_p4 = scmp.eq.s32.totalorder %s682_s17, 1 }
   0x8   : > { %s1002_s21 = scalar_select %p89_p1, %s937_s14, %s91_s19  }
   0x9   : > { %p1004_p5 = por %p102_p2, %p101_p0  ;;  %p1008_p6 = por %p108_p4, %p107_p3 }
   0xa   : > { %p685_p7 = scmp.ge.s32.totalorder %s941_s15, 1  ;;  %p141_p8 = scmp.lt.s32.totalorder %s941_s15, 3 }
   0xc   : > { %p142_p9 = pnand %p685_p7, %p141_p8 }
   0xd   : > { %v204_v0 = vld [vmem:[%s1230_s1] sm:$0xff] (!%p142_p9)  ;;  %v205_v1 = vld [vmem:[%s1230_s1 + $0x8] sm:$0xff] (!%p142_p9)  ;;  %v206_v2 = vld [vmem:[%s1230_s1 + $0x10] sm:$0xff] (!%p142_p9)  ;;  %s687_s30 = sshll.u32 (!%p142_p9), %s987_s16, 5  ;;  %vm313_vm0 = vcmask (!%p142_p9), 1043456   ;;  %vm216_vm1 = vcmask (!%p142_p9), 293888  }
   0xe   : > { %145 = sbr.rel (%p142_p9) target bundleno = 287 (0x11f), region = 32  ;;  %v824_v3 = vpack.c.bf16 (!%p142_p9), %v205_v1, %v204_v0  ;;  %v207_v4 = vld [vmem:[%s1230_s1 + $0x18] sm:$0xff] (!%p142_p9)  ;;  %p166_p10 = scmp.lt.s32.totalorder (!%p142_p9), %s687_s30, 63  ;;  %v208_v6 = vld [vmem:[%s1230_s1 + $0x20] sm:$0xf] (!%p142_p9) }
   0xf   : > { %v828_v5 = vpack.c.bf16 (!%p142_p9), %v207_v4, %v206_v2  ;;  %s162_s17 = sand.u32 (!%p142_p9), 1, %s933_s13   ;;  %v1107_v39 = vld [vmem:[%s1231_s2] ss:$0 sm:$0xff] (!%p142_p9)  ;;  %s728_s26 = sshll.u32 (!%p142_p9), %s987_s16, 12 }
  0x10   : > { %825 = vmatprep.subr.bf16.mxu0 (!%p142_p9), %v824_v3  ;;  %832 = vmatprep.subr.bf16.mxu1 (!%p142_p9), %v824_v3  ;;  %s686_s24 = sshll.u32 (!%p142_p9), %s162_s17, 8  ;;  %s1178_s29 = scalar_lea.hbm (!%p142_p9), %s1232_s3, %s728_s26 }
  0x11   : > { %827 = vmatpush3.bf16.msra.mxu0 (!%p142_p9), %v824_v3  ;;  %835 = vmatpush3.bf16.msra.mxu1 (!%p142_p9), %v824_v3  ;;  %s1115_s25 = scalar_lea.vmem (!%p142_p9), [#allocation2], %s686_s24  ;;  %s943_s5 = smov (!%p142_p9), [#allocation2]  }
  0x12   : > { %829 = vmatprep.subr.bf16.mxu0 (!%p142_p9), %v828_v5  ;;  %833 = vmatprep.subr.bf16.mxu1 (!%p142_p9), %v828_v5  ;;  %s620_s27 = sshll.u32 (!%p142_p9), %s1115_s25, 4  ;;  %s1180_s27 = int_to_ptr.vmem [resolvable:$true] %s620_s27 }
  0x13   : > { %s879_s4 = scalar_lea.vmem (!%p142_p9), %s1180_s27, 4096 }
  0x14   : > { %p880_p11 = scmp.ne.s32.totalorder (!%p142_p9), %s1180_s27, %s879_s4 }
  0x15   : > { %s1240_s30 = smov (!%p166_p10, %s687_s30), 63  ;;  %831 = vmatpush3.bf16.msra.mxu0 %v828_v5  ;;  %836 = vmatpush3.bf16.msra.mxu1 %v828_v5 }
  0x16   : > { %s688_s6 = sshll.u32 %s1240_s30, 3  ;;  %774 = vmatprep.subr.msk.mxu0 %vm313_vm0, %v208_v6  ;;  %834 = vmatprep.subr.msk.mxu1 %vm313_vm0, %v208_v6  ;;  %s1188_s30 = scalar_lea.sflag [#allocation3], %s162_s17 }
  0x17   : > { %s1033_s11 = scalar_lea.vmem %s1229_s0, %s688_s6  ;;  %p881_p12 = pnand %p880_p11, %p1004_p5 }
  0x18   : > { %v172_v7 = vld [vmem:[%s1033_s11] sm:$0xff]  ;;  %v173_v9 = vld [vmem:[%s1033_s11 + $0x8] sm:$0xff]  ;;  %v174_v11 = vld [vmem:[%s1033_s11 + $0x10] sm:$0xff]  ;;  %s883_s6 = sshll.u32 %s943_s5, 4  ;;  %s884_s6 = int_to_ptr.vmem [resolvable:$false] %s883_s6 }
  0x19   : > { %v188_v8 = vld [vmem:[%s1033_s11 + $0x80] sm:$0xff]  ;;  %776 = vmatprep.mubr.msk.f32.mxu0 %vm216_vm1, %v172_v7  ;;  %v189_v10 = vld [vmem:[%s1033_s11 + $0x88] sm:$0xff]  ;;  %v190_v12 = vld [vmem:[%s1033_s11 + $0x90] sm:$0xff]  ;;  %775 = vmatpush3.msk.msra.mxu0 %vm313_vm0, %v208_v6  ;;  %p882_p13 = pneg %p881_p12  ;;  %s885_s7 = scalar_lea.vmem %s884_s6, 8192 }
  0x1a   : > { %800 = vmatprep.mubr.msk.f32.mxu1 %vm216_vm1, %v188_v8  ;;  %837 = vmatpush3.msk.msra.mxu1 %vm313_vm0, %v208_v6  ;;  %v175_v13 = vld [vmem:[%s1033_s11 + $0x18] sm:$0xff]  ;;  %v176_v15 = vld [vmem:[%s1033_s11 + $0x20] sm:$0xff]  ;;  %v177_v17 = vld [vmem:[%s1033_s11 + $0x28] sm:$0xff]  ;;  %p886_p0 = scmp.lt.s32.totalorder %s1180_s27, %s884_s6  ;;  %p887_p1 = scmp.lt.s32.totalorder %s885_s7, %s879_s4 }
  0x1b   : > { %777 = vmatmul.mubr.msk.f32.vlgmr.msra.gmra.mrb[0].mxu0 %vm216_vm1, %v173_v9  ;;  %801 = vmatmul.mubr.msk.f32.vlgmr.msra.gmra.mrb[0].mxu1 %vm216_vm1, %v189_v10  ;;  %v191_v14 = vld [vmem:[%s1033_s11 + $0x98] sm:$0xff]  ;;  %v192_v16 = vld [vmem:[%s1033_s11 + $0xa0] sm:$0xff]  ;;  %v193_v18 = vld [vmem:[%s1033_s11 + $0xa8] sm:$0xff] }
  0x1c   : > { %779 = vmatprep.mubr.msk.f32.mxu0 %vm216_vm1, %v174_v11  ;;  %803 = vmatprep.mubr.msk.f32.mxu1 %vm216_vm1, %v190_v12  ;;  %v178_v19 = vld [vmem:[%s1033_s11 + $0x30] sm:$0xff]  ;;  %v179_v21 = vld [vmem:[%s1033_s11 + $0x38] sm:$0xff]  ;;  %v180_v23 = vld [vmem:[%s1033_s11 + $0x40] sm:$0xff]  ;;  %p888_p2 = por %p887_p1, %p886_p0 }
  0x1d   : > { %v194_v20 = vld [vmem:[%s1033_s11 + $0xb0] sm:$0xff]  ;;  %v195_v22 = vld [vmem:[%s1033_s11 + $0xb8] sm:$0xff]  ;;  %v196_v24 = vld [vmem:[%s1033_s11 + $0xc0] sm:$0xff] }
  0x1e   : > { %v181_v25 = vld [vmem:[%s1033_s11 + $0x48] sm:$0xff]  ;;  %v182_v27 = vld [vmem:[%s1033_s11 + $0x50] sm:$0xff]  ;;  %v183_v29 = vld [vmem:[%s1033_s11 + $0x58] sm:$0xff]  ;;  %p889_p3 = pnand %p888_p2, %p882_p13 }
  0x1f   : > { %780 = vmatmul.mubr.msk.f32.gmra.mrb[2].mxu0 %vm216_vm1, %v175_v13  ;;  %804 = vmatmul.mubr.msk.f32.gmra.mrb[2].mxu1 %vm216_vm1, %v191_v14  ;;  %v197_v26 = vld [vmem:[%s1033_s11 + $0xc8] sm:$0xff]  ;;  %v198_v28 = vld [vmem:[%s1033_s11 + $0xd0] sm:$0xff]  ;;  %v199_v30 = vld [vmem:[%s1033_s11 + $0xd8] sm:$0xff] }
  0x20   : > { %782 = vmatprep.mubr.msk.f32.mxu0 %vm216_vm1, %v176_v15  ;;  %806 = vmatprep.mubr.msk.f32.mxu1 %vm216_vm1, %v192_v16  ;;  %v184_v31 = vld [vmem:[%s1033_s11 + $0x60] sm:$0xff]  ;;  %v185_v33 = vld [vmem:[%s1033_s11 + $0x68] sm:$0xff]  ;;  %v186_v35 = vld [vmem:[%s1033_s11 + $0x70] sm:$0xff] }
  0x21   : > { %v200_v32 = vld [vmem:[%s1033_s11 + $0xe0] sm:$0xff]  ;;  %v201_v34 = vld [vmem:[%s1033_s11 + $0xe8] sm:$0xff]  ;;  %v202_v36 = vld [vmem:[%s1033_s11 + $0xf0] sm:$0xff] }
  0x22   : > { %v187_v37 = vld [vmem:[%s1033_s11 + $0x78] sm:$0xff] }
  0x23   : > { %783 = vmatmul.mubr.msk.f32.gmra.mrb[4].mxu0 %vm216_vm1, %v177_v17  ;;  %807 = vmatmul.mubr.msk.f32.gmra.mrb[4].mxu1 %vm216_vm1, %v193_v18  ;;  %v203_v38 = vld [vmem:[%s1033_s11 + $0xf8] sm:$0xff] }
  0x24   : > { %785 = vmatprep.mubr.msk.f32.mxu0 %vm216_vm1, %v178_v19  ;;  %809 = vmatprep.mubr.msk.f32.mxu1 %vm216_vm1, %v194_v20 }
  0x27   : > { %786 = vmatmul.mubr.msk.f32.gmra.mrb[6].mxu0 %vm216_vm1, %v179_v21  ;;  %810 = vmatmul.mubr.msk.f32.gmra.mrb[6].mxu1 %vm216_vm1, %v195_v22 }
  0x28   : > { %788 = vmatprep.mubr.msk.f32.mxu0 %vm216_vm1, %v180_v23  ;;  %812 = vmatprep.mubr.msk.f32.mxu1 %vm216_vm1, %v196_v24 }
  0x2b   : > { %789 = vmatmul.mubr.msk.f32.gmra.mrb[8].mxu0 %vm216_vm1, %v181_v25  ;;  %813 = vmatmul.mubr.msk.f32.gmra.mrb[8].mxu1 %vm216_vm1, %v197_v26 }
  0x2c   : > { %791 = vmatprep.mubr.msk.f32.mxu0 %vm216_vm1, %v182_v27  ;;  %815 = vmatprep.mubr.msk.f32.mxu1 %vm216_vm1, %v198_v28 }
  0x2f   : > { %792 = vmatmul.mubr.msk.f32.gmra.mrb[10].mxu0 %vm216_vm1, %v183_v29  ;;  %816 = vmatmul.mubr.msk.f32.gmra.mrb[10].mxu1 %vm216_vm1, %v199_v30 }
  0x30   : > { %794 = vmatprep.mubr.msk.f32.mxu0 %vm216_vm1, %v184_v31  ;;  %818 = vmatprep.mubr.msk.f32.mxu1 %vm216_vm1, %v200_v32 }
  0x33   : > { %795 = vmatmul.mubr.msk.f32.gmra.mrb[12].mxu0 %vm216_vm1, %v185_v33  ;;  %819 = vmatmul.mubr.msk.f32.gmra.mrb[12].mxu1 %vm216_vm1, %v201_v34 }
  0x34   : > { %797 = vmatprep.mubr.msk.f32.mxu0 %vm216_vm1, %v186_v35  ;;  %821 = vmatprep.mubr.msk.f32.mxu1 %vm216_vm1, %v202_v36 }
  0x37   : > { %798 = vmatmul.mubr.msk.f32.gmra.mrb[14].mxu0 %vm216_vm1, %v187_v37  ;;  %822 = vmatmul.mubr.msk.f32.gmra.mrb[14].mxu1 %vm216_vm1, %v203_v38 }
  0xee   : > { %v778_v40 = vpop.f32.mrb[0].mxu0  ;;  %v802_v41 = vpop.f32.mrb[0].mxu1 }
  0xef   : > { %v389_v42 = vadd.f32 %v778_v40, %v1107_v39  ;;  %v469_v43 = vadd.f32 %v802_v41, %v1107_v39  ;;  %v383_v44 = vpop.f32.mrb[1].mxu0  ;;  %v463_v45 = vpop.f32.mrb[1].mxu1 }
  0xf0   : > { %v384_v46 = vadd.f32 %v1107_v39, %v383_v44  ;;  %v464_v47 = vadd.f32 %v1107_v39, %v463_v45 }
  0xf1   : > { %v543_v48 = vmax.f32 %v389_v42, 0.0  ;;  %v559_v49 = vmax.f32 %v469_v43, 0.0 }
  0xf2   : > { %v542_v50 = vmax.f32 %v384_v46, 0.0  ;;  %v558_v51 = vmax.f32 %v464_v47, 0.0  ;;  %v781_v52 = vpop.f32.mrb[2].mxu0  ;;  %v805_v53 = vpop.f32.mrb[2].mxu1 }
  0xf3   : > { %575 = vst [vmem:[%s1115_s25 + $0x8] sm:$0xff] %v543_v48  ;;  %591 = vst [vmem:[%s1115_s25 + $0x88] sm:$0xff] %v559_v49  ;;  %v399_v54 = vadd.f32 %v781_v52, %v1107_v39  ;;  %v479_v55 = vadd.f32 %v805_v53, %v1107_v39  ;;  %v393_v56 = vpop.f32.mrb[3].mxu0  ;;  %v473_v57 = vpop.f32.mrb[3].mxu1 }
  0xf4   : > { %574 = vst [vmem:[%s1115_s25] sm:$0xff] %v542_v50  ;;  %590 = vst [vmem:[%s1115_s25 + $0x80] sm:$0xff] %v558_v51  ;;  %v394_v58 = vadd.f32 %v1107_v39, %v393_v56  ;;  %v474_v59 = vadd.f32 %v1107_v39, %v473_v57 }
  0xf5   : > { %v545_v60 = vmax.f32 %v399_v54, 0.0  ;;  %v561_v61 = vmax.f32 %v479_v55, 0.0 }
  0xf6   : > { %v544_v62 = vmax.f32 %v394_v58, 0.0  ;;  %v560_v63 = vmax.f32 %v474_v59, 0.0  ;;  %v784_v0 = vpop.f32.mrb[4].mxu0  ;;  %v808_v1 = vpop.f32.mrb[4].mxu1 }
  0xf7   : > { %577 = vst [vmem:[%s1115_s25 + $0x18] sm:$0xff] %v545_v60  ;;  %593 = vst [vmem:[%s1115_s25 + $0x98] sm:$0xff] %v561_v61  ;;  %v409_v2 = vadd.f32 %v784_v0, %v1107_v39  ;;  %v489_v3 = vadd.f32 %v808_v1, %v1107_v39  ;;  %v403_v4 = vpop.f32.mrb[5].mxu0  ;;  %v483_v5 = vpop.f32.mrb[5].mxu1 }
  0xf8   : > { %576 = vst [vmem:[%s1115_s25 + $0x10] sm:$0xff] %v544_v62  ;;  %592 = vst [vmem:[%s1115_s25 + $0x90] sm:$0xff] %v560_v63  ;;  %v404_v6 = vadd.f32 %v1107_v39, %v403_v4  ;;  %v484_v7 = vadd.f32 %v1107_v39, %v483_v5 }
  0xf9   : > { %v547_v8 = vmax.f32 %v409_v2, 0.0  ;;  %v563_v9 = vmax.f32 %v489_v3, 0.0 }
  0xfa   : > { %v546_v10 = vmax.f32 %v404_v6, 0.0  ;;  %v562_v11 = vmax.f32 %v484_v7, 0.0  ;;  %v787_v12 = vpop.f32.mrb[6].mxu0  ;;  %v811_v13 = vpop.f32.mrb[6].mxu1 }
  0xfb   : > { %579 = vst [vmem:[%s1115_s25 + $0x28] sm:$0xff] %v547_v8  ;;  %595 = vst [vmem:[%s1115_s25 + $0xa8] sm:$0xff] %v563_v9  ;;  %v419_v14 = vadd.f32 %v787_v12, %v1107_v39  ;;  %v499_v15 = vadd.f32 %v811_v13, %v1107_v39  ;;  %v413_v16 = vpop.f32.mrb[7].mxu0  ;;  %v493_v17 = vpop.f32.mrb[7].mxu1 }
  0xfc   : > { %578 = vst [vmem:[%s1115_s25 + $0x20] sm:$0xff] %v546_v10  ;;  %594 = vst [vmem:[%s1115_s25 + $0xa0] sm:$0xff] %v562_v11  ;;  %v414_v18 = vadd.f32 %v1107_v39, %v413_v16  ;;  %v494_v19 = vadd.f32 %v1107_v39, %v493_v17 }
  0xfd   : > { %v549_v20 = vmax.f32 %v419_v14, 0.0  ;;  %v565_v21 = vmax.f32 %v499_v15, 0.0 }
  0xfe   : > { %v548_v22 = vmax.f32 %v414_v18, 0.0  ;;  %v564_v23 = vmax.f32 %v494_v19, 0.0  ;;  %v790_v24 = vpop.f32.mrb[8].mxu0  ;;  %v814_v25 = vpop.f32.mrb[8].mxu1 }
  0xff   : > { %581 = vst [vmem:[%s1115_s25 + $0x38] sm:$0xff] %v549_v20  ;;  %597 = vst [vmem:[%s1115_s25 + $0xb8] sm:$0xff] %v565_v21  ;;  %v429_v26 = vadd.f32 %v790_v24, %v1107_v39  ;;  %v509_v27 = vadd.f32 %v814_v25, %v1107_v39  ;;  %v423_v28 = vpop.f32.mrb[9].mxu0  ;;  %v503_v29 = vpop.f32.mrb[9].mxu1 }
 0x100   : > { %580 = vst [vmem:[%s1115_s25 + $0x30] sm:$0xff] %v548_v22  ;;  %596 = vst [vmem:[%s1115_s25 + $0xb0] sm:$0xff] %v564_v23  ;;  %v424_v30 = vadd.f32 %v1107_v39, %v423_v28  ;;  %v504_v31 = vadd.f32 %v1107_v39, %v503_v29 }
 0x101   : > { %v551_v32 = vmax.f32 %v429_v26, 0.0  ;;  %v567_v33 = vmax.f32 %v509_v27, 0.0 }
 0x102   : > { %v550_v34 = vmax.f32 %v424_v30, 0.0  ;;  %v566_v35 = vmax.f32 %v504_v31, 0.0  ;;  %v793_v36 = vpop.f32.mrb[10].mxu0  ;;  %v817_v37 = vpop.f32.mrb[10].mxu1 }
 0x103   : > { %583 = vst [vmem:[%s1115_s25 + $0x48] sm:$0xff] %v551_v32  ;;  %599 = vst [vmem:[%s1115_s25 + $0xc8] sm:$0xff] %v567_v33  ;;  %v439_v38 = vadd.f32 %v793_v36, %v1107_v39  ;;  %v519_v40 = vadd.f32 %v817_v37, %v1107_v39  ;;  %v433_v41 = vpop.f32.mrb[11].mxu0  ;;  %v513_v42 = vpop.f32.mrb[11].mxu1 }
 0x104   : > { %582 = vst [vmem:[%s1115_s25 + $0x40] sm:$0xff] %v550_v34  ;;  %598 = vst [vmem:[%s1115_s25 + $0xc0] sm:$0xff] %v566_v35  ;;  %v434_v43 = vadd.f32 %v1107_v39, %v433_v41  ;;  %v514_v44 = vadd.f32 %v1107_v39, %v513_v42 }
 0x105   : > { %v553_v45 = vmax.f32 %v439_v38, 0.0  ;;  %v569_v46 = vmax.f32 %v519_v40, 0.0 }
 0x106   : > { %v552_v47 = vmax.f32 %v434_v43, 0.0  ;;  %v568_v48 = vmax.f32 %v514_v44, 0.0  ;;  %v796_v49 = vpop.f32.mrb[12].mxu0  ;;  %v820_v50 = vpop.f32.mrb[12].mxu1 }
 0x107   : > { %585 = vst [vmem:[%s1115_s25 + $0x58] sm:$0xff] %v553_v45  ;;  %601 = vst [vmem:[%s1115_s25 + $0xd8] sm:$0xff] %v569_v46  ;;  %v449_v51 = vadd.f32 %v796_v49, %v1107_v39  ;;  %v529_v52 = vadd.f32 %v820_v50, %v1107_v39  ;;  %v443_v53 = vpop.f32.mrb[13].mxu0  ;;  %v523_v54 = vpop.f32.mrb[13].mxu1 }
 0x108   : > { %584 = vst [vmem:[%s1115_s25 + $0x50] sm:$0xff] %v552_v47  ;;  %600 = vst [vmem:[%s1115_s25 + $0xd0] sm:$0xff] %v568_v48  ;;  %v444_v55 = vadd.f32 %v1107_v39, %v443_v53  ;;  %v524_v56 = vadd.f32 %v1107_v39, %v523_v54 }
 0x109   : > { %v555_v57 = vmax.f32 %v449_v51, 0.0  ;;  %v571_v58 = vmax.f32 %v529_v52, 0.0 }
 0x10a   : > { %v554_v59 = vmax.f32 %v444_v55, 0.0  ;;  %v570_v60 = vmax.f32 %v524_v56, 0.0  ;;  %v799_v61 = vpop.f32.mrb[14].mxu0  ;;  %v823_v62 = vpop.f32.mrb[14].mxu1 }
 0x10b   : > { %587 = vst [vmem:[%s1115_s25 + $0x68] sm:$0xff] %v555_v57  ;;  %603 = vst [vmem:[%s1115_s25 + $0xe8] sm:$0xff] %v571_v58  ;;  %v459_v63 = vadd.f32 %v799_v61, %v1107_v39  ;;  %v539_v0 = vadd.f32 %v823_v62, %v1107_v39  ;;  %v453_v1 = vpop.f32.mrb[15].mxu0  ;;  %v533_v2 = vpop.f32.mrb[15].mxu1 }
 0x10c   : > { %586 = vst [vmem:[%s1115_s25 + $0x60] sm:$0xff] %v554_v59  ;;  %602 = vst [vmem:[%s1115_s25 + $0xe0] sm:$0xff] %v570_v60  ;;  %v454_v3 = vadd.f32 %v1107_v39, %v453_v1  ;;  %v534_v4 = vadd.f32 %v1107_v39, %v533_v2 }
 0x10d   : > { %v557_v5 = vmax.f32 %v459_v63, 0.0  ;;  %v573_v6 = vmax.f32 %v539_v0, 0.0 }
 0x10e   : > { %v556_v7 = vmax.f32 %v454_v3, 0.0  ;;  %v572_v8 = vmax.f32 %v534_v4, 0.0 }
 0x10f   : > { %589 = vst [vmem:[%s1115_s25 + $0x78] sm:$0xff] %v557_v5  ;;  %605 = vst [vmem:[%s1115_s25 + $0xf8] sm:$0xff] %v573_v6 }
 0x110   : > { %588 = vst [vmem:[%s1115_s25 + $0x70] sm:$0xff] %v556_v7  ;;  %604 = vst [vmem:[%s1115_s25 + $0xf0] sm:$0xff] %v572_v8 }
 0x111   : > { %892 = shalt.err (!%p889_p3)
}
 0x112   : > { %s893_s8 = scalar_lea.hbm %s1178_s29, 4096  ;;  %s897_s11 = scalar_lea.hbm %s1232_s3, 8192 }
 0x113   : > { %p894_p4 = scmp.ne.s32.totalorder %s1178_s29, %s893_s8  ;;  %p898_p9 = scmp.lt.u32.totalorder %s1178_s29, %s1232_s3 }
 0x114   : > { %p899_p10 = scmp.lt.u32.totalorder %s897_s11, %s893_s8  ;;  %p901_p12 = scmp.lt.u32.totalorder %s893_s8, %s1178_s29 }
 0x115   : > { %p895_p7 = pnand %p894_p4, %p1004_p5 }
 0x116   : > { %p900_p11 = por %p899_p10, %p898_p9 }
 0x117   : > { %p896_p8 = pneg %p895_p7 }
 0x118   : > { %p902_p13 = por %p901_p12, %p900_p11 }
 0x11a   : > { %p903_p0 = pnand %p902_p13, %p896_p8 }
 0x11c   : > { %906 = shalt.err (!%p903_p0)
}
 0x11d   : > { %s944_s20 = smov 128   ;;  %s945_s24 = smov 8  }
 0x11e   : > { %838 = dma.vmem_to_hbm [thread:$0]  (%p1004_p5), %s1180_s27, 4096, %s1178_s29, %s1188_s30, %s944_s20, %s944_s20, %s945_s24  }
 0x11f PF: > { %p844_p1 = scmp.ge.s32.totalorder %s941_s15, 2  ;;  %s635_s25 = sand.u32 1, %s929_s12  }
 0x120   : > { %s636_s26 = scalar_lea.sflag [#allocation3], %s635_s25 }
 0x121   : > { %p841_p2 = pnand %p844_p1, %p1008_p6 }
 0x123   : > { %924 = dma.done.wait (!%p841_p2), %s636_s26, 4096  }
 0x124   : > { %926 = vsyncadd (!%p841_p2), %s636_s26, 4294963200  ;;  %p13_p3 = scmp.ge.s32.totalorder %s991_s18, 4   ;;  %s1235_s12 = smov %s933_s13 }
 0x125   : > { %s1236_s13 = smov %s937_s14  ;;  %s1237_s14 = smov %s1002_s21 }
 0x126   : > { %s1238_s15 = smov %s991_s18  ;;  %15 = sbr.rel (!%p13_p3) target bundleno = 3 (0x3), region = 67 }
 0x12d   :  { %641 = vsyncpa [#allocation3], 1 }
 0x12e   :  { %643 = vsyncpa [#allocation3 + $0x1], 1 }

</bundles_post_ra>
